<compile_context>
chip_gen: v6e
topology: v6e:2x2x1
jax: 0.10.0
libtpu: 0.0.40
codegen_flags: <defaults>
</compile_context>

<pallas_src>
import functools

import jax
import jax.numpy as jnp
import numpy as np
from jax.experimental import pallas as pl
from jax.experimental.pallas import tpu as pltpu

FS = 16000
FRAME_LEN = 400            # 25 ms
HOP = 160                  # 10 ms
N_FFT = 512                # round_to_power_of_two
N_FREQ = N_FFT // 2        # 256 (Nyquist bin dropped: zero mel weight in Kaldi)
N_MELS = 80
N_MELS_PAD = 128           # lane-dense output width (sliced to 80 outside)
PREEMPH = 0.97
LOW_FREQ = 20.0
HIGH_FREQ = FS / 2.0
EPS = float(np.finfo(np.float32).eps)   # == torch.finfo(torch.float32).eps
MAX_TILE_FRAMES = 512      # frames per grid step (multiple of 16)
TAIL_ROWS = 8              # extra hop-chunks per tile (need 2; 8 keeps sublane alignment)


# ---------------------------------------------------------------------------
# Constant matrices (deterministic numpy, built once, folded in float64)
# ---------------------------------------------------------------------------
def _fused_dft_matrix() -> np.ndarray:
    """(FRAME_LEN, 2*N_FREQ) weight: frame @ W -> [real | imag]."""
    n = FRAME_LEN
    i = np.arange(n, dtype=np.float64)
    # povey window = hann(periodic=False) ** 0.85
    povey = (0.5 - 0.5 * np.cos(2.0 * np.pi * i / (n - 1))) ** 0.85
    # DC-offset removal: x -> x - mean(x)
    D = np.eye(n) - np.ones((n, n)) / n
    # pre-emphasis with replicate pad of the first in-frame sample
    P = np.eye(n)
    P[np.arange(1, n), np.arange(0, n - 1)] -= PREEMPH
    P[0, 0] -= PREEMPH
    Tm = np.diag(povey) @ P @ D                      # (400, 400) acts on column x
    k = np.arange(N_FREQ, dtype=np.float64)          # bins 0..255 of a 512-pt FFT
    ang = 2.0 * np.pi * np.outer(np.arange(n, dtype=np.float64), k) / N_FFT
    cos_m = Tm.T @ np.cos(ang)                       # (400, 256)
    sin_m = Tm.T @ (-np.sin(ang))                    # (400, 256)
    return np.concatenate([cos_m, sin_m], axis=1).astype(np.float32)  # (400, 512)


def _stacked_dft_weight() -> np.ndarray:
    """Split the fused weight into 3 hop-sized K-slabs -> (3, HOP, 512)."""
    w = _fused_dft_matrix()
    out = np.zeros((3, HOP, 2 * N_FREQ), dtype=np.float32)
    out[0] = w[0:HOP]
    out[1] = w[HOP:2 * HOP]
    out[2, :FRAME_LEN - 2 * HOP] = w[2 * HOP:FRAME_LEN]   # rows 80..159 stay zero
    return out


def _kaldi_mel_banks_padded() -> np.ndarray:
    """torchaudio.compliance.kaldi.get_mel_banks -> (N_FREQ, N_MELS_PAD) f32."""
    def mel(f):
        return 1127.0 * np.log(1.0 + np.asarray(f, dtype=np.float64) / 700.0)

    fft_bin_width = FS / N_FFT
    mel_low, mel_high = mel(LOW_FREQ), mel(HIGH_FREQ)
    mel_delta = (mel_high - mel_low) / (N_MELS + 1)
    b = np.arange(N_MELS, dtype=np.float64)[:, None]
    left = mel_low + b * mel_delta
    center = mel_low + (b + 1) * mel_delta
    right = mel_low + (b + 2) * mel_delta
    freqs = mel(fft_bin_width * np.arange(N_FREQ, dtype=np.float64))[None, :]
    up = (freqs - left) / (center - left)
    down = (right - freqs) / (right - center)
    fb = np.maximum(0.0, np.minimum(up, down))       # (80, 256)
    fb_t = fb.T.astype(np.float32)                   # (256, 80)
    out = np.zeros((N_FREQ, N_MELS_PAD), dtype=np.float32)
    out[:, :N_MELS] = fb_t                           # zero-padded extra lanes
    return out


_DFT_NP = _stacked_dft_weight()
_MEL_NP = _kaldi_mel_banks_padded()


# ---------------------------------------------------------------------------
# Pallas kernel: one tile of TF frames of one batch row per grid step.
#   main (TF, 160) + tail (8, 160) hop-chunks  ->  3 hop-shifted matmuls
#   -> [real|imag] -> power -> mel -> log
# ---------------------------------------------------------------------------
def _fbank_kernel(main_ref, tail_ref, dft_ref, mel_ref, out_ref):
    tf = main_ref.shape[0]
    # (tf+8, 160) bf16; concat is sublane-aligned (tf is a multiple of 16).
    slab = jnp.concatenate([main_ref[...], tail_ref[...]], axis=0)
    # frame i = samples [i*HOP, i*HOP+400) = chunks i, i+1, i+2 (first 80 of i+2);
    # the third weight slab has zero rows 80..159, so using the full chunk is exact.
    y = jnp.dot(slab[0:tf], dft_ref[0], preferred_element_type=jnp.float32)
    y = y + jnp.dot(slab[1:tf + 1], dft_ref[1], preferred_element_type=jnp.float32)
    y = y + jnp.dot(slab[2:tf + 2], dft_ref[2], preferred_element_type=jnp.float32)
    real = y[:, :N_FREQ]                                      # lane-aligned split
    imag = y[:, N_FREQ:]
    power = real * real + imag * imag                         # (tf, 256)
    mel = jnp.dot(power, mel_ref[...],
                  preferred_element_type=jnp.float32)         # (tf, 128)
    out_ref[...] = jnp.log(jnp.maximum(mel, EPS))


@jax.jit
def logmel_forward(feat: jnp.ndarray, ilens: jnp.ndarray | None = None):
    """feat: (B, num_samples) f32 -> (logmel (B, T, 80), lens (B,) int32)."""
    B, L = feat.shape
    assert L >= FRAME_LEN, "need at least one 25 ms frame"
    T = 1 + (L - FRAME_LEN) // HOP                   # snip_edges framing

    TF = min(MAX_TILE_FRAMES, -(-T // 16) * 16)      # frames per tile (mult of 16)
    n_tiles = -(-T // TF)
    T_pad = n_tiles * TF
    NC = T_pad + TAIL_ROWS                           # hop chunks needed per row
    L_need = NC * HOP                                # always > L for snip_edges

    # Single cheap XLA pass: zero-pad to hop-aligned length, view as hop chunks,
    # cast to bf16 (halves the HBM stream the kernel reads).
    # TODO(synk): manual-DMA the raw (B, L) waveform from HBM (pl.ANY) to also
    # skip this pad/cast pass when L is already hop-aligned.
    feat_p = jnp.pad(feat, ((0, 0), (0, L_need - L)))
    chunks = feat_p.reshape(B, NC, HOP).astype(jnp.bfloat16)

    dft = jnp.asarray(_DFT_NP, dtype=jnp.bfloat16)   # (3, 160, 512)
    mel_fb = jnp.asarray(_MEL_NP)                    # (256, 128) f32

    out_padded = pl.pallas_call(
        _fbank_kernel,
        out_shape=jax.ShapeDtypeStruct((B, T_pad, N_MELS_PAD), jnp.float32),
        grid_spec=pltpu.PrefetchScalarGridSpec(
            num_scalar_prefetch=0,
            grid=(B, n_tiles),
            in_specs=[
                # main window: chunks [ft*TF, ft*TF + TF)
                pl.BlockSpec((None, TF, HOP), lambda b, ft: (b, ft, 0)),
                # tail window: chunks [(ft+1)*TF, (ft+1)*TF + 8)   (same array)
                pl.BlockSpec((None, TAIL_ROWS, HOP),
                             lambda b, ft: (b, (ft + 1) * (TF // TAIL_ROWS), 0)),
                pl.BlockSpec((3, HOP, 2 * N_FREQ), lambda b, ft: (0, 0, 0)),
                pl.BlockSpec((N_FREQ, N_MELS_PAD), lambda b, ft: (0, 0)),
            ],
            out_specs=pl.BlockSpec((None, TF, N_MELS_PAD),
                                   lambda b, ft: (b, ft, 0)),
        ),
        compiler_params=pltpu.CompilerParams(
            dimension_semantics=("parallel", "parallel"),
        ),
    )(chunks, chunks, dft, mel_fb)

    logmel = out_padded[:, :T, :N_MELS]

    if ilens is not None:
        # make_pad_mask(ilens, ., 1): zero frames t >= ilens[b]
        valid = (jnp.arange(T)[None, :] < ilens[:, None]).astype(logmel.dtype)
        logmel = logmel * valid[:, :, None]
        lens = ilens.astype(jnp.int32)
    else:
        lens = jnp.full((B,), T, dtype=jnp.int32)
    return logmel, lens


if __name__ == "__main__":
    key = jax.random.PRNGKey(0)
    B, L = 2, 2400                      # -> T = 1 + (2400-400)//160 = 13 frames
    feat = jax.random.normal(key, (B, L), dtype=jnp.float32)

    logmel, lens = logmel_forward(feat)
    jax.block_until_ready(logmel)
    jax.block_until_ready(lens)

    T = 1 + (L - FRAME_LEN) // HOP
    assert logmel.shape == (B, T, N_MELS), logmel.shape
    assert lens.shape == (B,)
    assert bool(jnp.all(lens == T))
    assert bool(jnp.all(jnp.isfinite(logmel)))
    print("KERNEL_OK")
</pallas_src>

<mosaic_0001>
module attributes {stable_mosaic.version = 11 : i64} {
  func.func @_fbank_kernel(%arg0: i32, %arg1: i32, %arg2: memref<1x16x160xbf16, #tpu.memory_space<vmem>>, %arg3: memref<1x8x160xbf16, #tpu.memory_space<vmem>>, %arg4: memref<3x160x512xbf16, #tpu.memory_space<vmem>>, %arg5: memref<256x128xf32, #tpu.memory_space<vmem>>, %arg6: memref<1x16x128xf32, #tpu.memory_space<vmem>>) attributes {dimension_semantics = [#tpu.dimension_semantics<parallel>, #tpu.dimension_semantics<parallel>], iteration_bounds = array<i64: 2, 1>, scalar_prefetch = 0 : i64, scratch_operands = 0 : i64, tpu.core_type = #tpu.core_type<tc>, window_params = [{transform_indices = @transform_0, window_bounds = array<i64: 1, 16, 160>}, {transform_indices = @transform_1, window_bounds = array<i64: 1, 8, 160>}, {pipeline_mode = #tpu.pipeline_mode<synchronous>, transform_indices = @transform_2, window_bounds = array<i64: 3, 160, 512>}, {pipeline_mode = #tpu.pipeline_mode<synchronous>, transform_indices = @transform_3, window_bounds = array<i64: 256, 128>}, {transform_indices = @transform_4, window_bounds = array<i64: 1, 16, 128>}]} {
    %c0 = arith.constant 0 : index
    %c0_0 = arith.constant 0 : index
    %c0_1 = arith.constant 0 : index
    %0 = vector.load %arg2[%c0, %c0_0, %c0_1] : memref<1x16x160xbf16, #tpu.memory_space<vmem>>, vector<1x16x160xbf16>
    %1 = vector.shape_cast %0 : vector<1x16x160xbf16> to vector<16x160xbf16>
    %c0_2 = arith.constant 0 : index
    %c0_3 = arith.constant 0 : index
    %c0_4 = arith.constant 0 : index
    %2 = vector.load %arg3[%c0_2, %c0_3, %c0_4] : memref<1x8x160xbf16, #tpu.memory_space<vmem>>, vector<1x8x160xbf16>
    %3 = vector.shape_cast %2 : vector<1x8x160xbf16> to vector<8x160xbf16>
    %4 = tpu.concatenate %1, %3 in 0 : vector<16x160xbf16>, vector<8x160xbf16> -> vector<24x160xbf16>
    %5 = vector.extract_strided_slice %4 {offsets = [0, 0], sizes = [16, 160], strides = [1, 1]} : vector<24x160xbf16> to vector<16x160xbf16>
    %c0_5 = arith.constant 0 : index
    %c0_6 = arith.constant 0 : index
    %c0_7 = arith.constant 0 : index
    %6 = vector.load %arg4[%c0_5, %c0_6, %c0_7] : memref<3x160x512xbf16, #tpu.memory_space<vmem>>, vector<1x160x512xbf16>
    %7 = vector.shape_cast %6 : vector<1x160x512xbf16> to vector<160x512xbf16>
    %cst = arith.constant dense<0.000000e+00> : vector<16x512xf32>
    %8 = tpu.matmul %5, %7, %cst {dimension_numbers = #tpu.dot_dimension_numbers<[1], [0], [0], [1], [0, 0, 1, 1], [], []>} : vector<16x160xbf16>, vector<160x512xbf16>, vector<16x512xf32> -> vector<16x512xf32>
    %9 = vector.extract_strided_slice %4 {offsets = [1, 0], sizes = [16, 160], strides = [1, 1]} : vector<24x160xbf16> to vector<16x160xbf16>
    %c1 = arith.constant 1 : index
    %c0_8 = arith.constant 0 : index
    %c0_9 = arith.constant 0 : index
    %10 = vector.load %arg4[%c1, %c0_8, %c0_9] : memref<3x160x512xbf16, #tpu.memory_space<vmem>>, vector<1x160x512xbf16>
    %11 = vector.shape_cast %10 : vector<1x160x512xbf16> to vector<160x512xbf16>
    %cst_10 = arith.constant dense<0.000000e+00> : vector<16x512xf32>
    %12 = tpu.matmul %9, %11, %cst_10 {dimension_numbers = #tpu.dot_dimension_numbers<[1], [0], [0], [1], [0, 0, 1, 1], [], []>} : vector<16x160xbf16>, vector<160x512xbf16>, vector<16x512xf32> -> vector<16x512xf32>
    %13 = arith.addf %8, %12 : vector<16x512xf32>
    %14 = vector.extract_strided_slice %4 {offsets = [2, 0], sizes = [16, 160], strides = [1, 1]} : vector<24x160xbf16> to vector<16x160xbf16>
    %c2 = arith.constant 2 : index
    %c0_11 = arith.constant 0 : index
    %c0_12 = arith.constant 0 : index
    %15 = vector.load %arg4[%c2, %c0_11, %c0_12] : memref<3x160x512xbf16, #tpu.memory_space<vmem>>, vector<1x160x512xbf16>
    %16 = vector.shape_cast %15 : vector<1x160x512xbf16> to vector<160x512xbf16>
    %cst_13 = arith.constant dense<0.000000e+00> : vector<16x512xf32>
    %17 = tpu.matmul %14, %16, %cst_13 {dimension_numbers = #tpu.dot_dimension_numbers<[1], [0], [0], [1], [0, 0, 1, 1], [], []>} : vector<16x160xbf16>, vector<160x512xbf16>, vector<16x512xf32> -> vector<16x512xf32>
    %18 = arith.addf %13, %17 : vector<16x512xf32>
    %19 = vector.extract_strided_slice %18 {offsets = [0, 0], sizes = [16, 256], strides = [1, 1]} : vector<16x512xf32> to vector<16x256xf32>
    %20 = vector.extract_strided_slice %18 {offsets = [0, 256], sizes = [16, 256], strides = [1, 1]} : vector<16x512xf32> to vector<16x256xf32>
    %21 = arith.mulf %19, %19 : vector<16x256xf32>
    %22 = arith.mulf %20, %20 : vector<16x256xf32>
    %23 = arith.addf %21, %22 : vector<16x256xf32>
    %c0_14 = arith.constant 0 : index
    %c0_15 = arith.constant 0 : index
    %24 = vector.load %arg5[%c0_14, %c0_15] : memref<256x128xf32, #tpu.memory_space<vmem>>, vector<256x128xf32>
    %cst_16 = arith.constant dense<0.000000e+00> : vector<16x128xf32>
    %25 = tpu.matmul %23, %24, %cst_16 {dimension_numbers = #tpu.dot_dimension_numbers<[1], [0], [0], [1], [0, 0, 1, 1], [], []>} : vector<16x256xf32>, vector<256x128xf32>, vector<16x128xf32> -> vector<16x128xf32>
    %cst_17 = arith.constant 1.1920929E-7 : f32
    %26 = vector.broadcast %cst_17 : f32 to vector<16x128xf32>
    %27 = arith.maximumf %25, %26 : vector<16x128xf32>
    %28 = math.log %27 : vector<16x128xf32>
    %c0_18 = arith.constant 0 : index
    %c0_19 = arith.constant 0 : index
    %c0_20 = arith.constant 0 : index
    %29 = vector.load %arg6[%c0_18, %c0_19, %c0_20] : memref<1x16x128xf32, #tpu.memory_space<vmem>>, vector<1x16x128xf32>
    %30 = vector.shape_cast %29 : vector<1x16x128xf32> to vector<16x128xf32>
    %31 = vector.shape_cast %28 : vector<16x128xf32> to vector<1x16x128xf32>
    tpu.vector_store %arg6[%c0_18, %c0_19, %c0_20], %31 {strides = array<i32>} : memref<1x16x128xf32, #tpu.memory_space<vmem>>, vector<1x16x128xf32>,
    return
  }
  func.func @transform_0(%arg0: i32, %arg1: i32) -> (i32, i32, i32) {
    %c0_i32 = arith.constant 0 : i32
    %c0_i32_0 = arith.constant 0 : i32
    return %arg0, %arg1, %c0_i32 : i32, i32, i32
  }
  func.func @transform_1(%arg0: i32, %arg1: i32) -> (i32, i32, i32) {
    %c1_i32 = arith.constant 1 : i32
    %0 = arith.addi %arg1, %c1_i32 : i32
    %c2_i32 = arith.constant 2 : i32
    %1 = arith.muli %0, %c2_i32 : i32
    %c0_i32 = arith.constant 0 : i32
    %c0_i32_0 = arith.constant 0 : i32
    return %arg0, %1, %c0_i32 : i32, i32, i32
  }
  func.func @transform_2(%arg0: i32, %arg1: i32) -> (i32, i32, i32) {
    %c0_i32 = arith.constant 0 : i32
    %c0_i32_0 = arith.constant 0 : i32
    %c0_i32_1 = arith.constant 0 : i32
    %c0_i32_2 = arith.constant 0 : i32
    return %c0_i32, %c0_i32_0, %c0_i32_1 : i32, i32, i32
  }
  func.func @transform_3(%arg0: i32, %arg1: i32) -> (i32, i32) {
    %c0_i32 = arith.constant 0 : i32
    %c0_i32_0 = arith.constant 0 : i32
    %c0_i32_1 = arith.constant 0 : i32
    return %c0_i32, %c0_i32_0 : i32, i32
  }
  func.func @transform_4(%arg0: i32, %arg1: i32) -> (i32, i32, i32) {
    %c0_i32 = arith.constant 0 : i32
    %c0_i32_0 = arith.constant 0 : i32
    return %arg0, %arg1, %c0_i32 : i32, i32, i32
  }
}

</mosaic_0001>

<bundles_post_ra>
// kernel: logmel_forward.1
= control target key start
LH: loop header
LB: loop body
LE: loop exit
PB: predicated region body
PF: predicated region fallthrough
CT: control target
= control target key end

     0   :  { %9 = vsyncpa [#allocation3], 0  ;;  %s2347_s0 = inlined_call_operand.vmem [shape: bf16[2,24,160], index: 0, kind: input, shape index: {}, may-alias: {0,1}]   ;;  %s2348_s1 = inlined_call_operand.vmem [shape: bf16[2,24,160], index: 1, kind: input, shape index: {}, may-alias: {0,1}]   ;;  %s2349_s2 = inlined_call_operand.hbm [shape: bf16[3,160,512], index: 2, kind: input, shape index: {}]   ;;  %s2350_s3 = inlined_call_operand.hbm [shape: f32[256,128], index: 3, kind: input, shape index: {}]   ;;  %s2351_s4 = inlined_call_operand.vmem [shape: f32[2,16,128], index: 4, kind: output, shape index: {}]  }
   0x1   :  { %10 = vsyncpa [#allocation5], 0  ;;  %s2226_s15 = smov 0   ;;  %s2228_s16 = smov 0  }
   0x2   :  { %s2230_s17 = smov 0  }
   0x3 LB: > { %s1652_s18 = sadd.s32 4294967295, %s2193_s17   ;;  %s28_s19 = sadd.s32 1, %s2189_s16  ;;  %s2193_s17 = sphi %s2230_s17, %s16_s17   ;;  %s2189_s16 = sphi %s2228_s16, %s2356_s16   ;;  %s2185_s15 = sphi %s2226_s15, %s2355_s15  }
   0x4   : > { %p30_p0 = scmp.ge.s32.totalorder %s28_s19, 2  ;;  %p1654_p1 = scmp.ge.s32.totalorder %s2193_s17, 1 }
   0x5   : > { %p163_p2 = scmp.lt.s32.totalorder %s2193_s17, 3  ;;  %p2251_p4 = scmp.eq.s32.totalorder %s1652_s18, 0 }
   0x6   : > { %s2358_s19 = smov (%p30_p0, %s28_s19), 0  ;;  %s2195_s22 = smov [#allocation2]  }
   0x7   : > { %p2247_p3 = pnand %p1654_p1, %p163_p2  ;;  %s175_s23 = sshll.u32 %s2195_s22, 4  ;;  %s176_s23 = int_to_ptr.vmem [resolvable:$true] %s175_s23 }
   0x8   : > { %s2196_s25 = smov [#allocation4]   ;;  %s2122_s27 = scalar_lea.vmem %s176_s23, 15360 }
   0x9   : > { %p1880_p5 = pneg %p2247_p3  ;;  %s188_s26 = sshll.u32 %s2196_s25, 4  ;;  %s189_s26 = int_to_ptr.vmem [resolvable:$true] %s188_s26 }
   0xa   : > { %p2123_p8 = scmp.ne.s32.totalorder %s176_s23, %s2122_s27  ;;  %p2130_p11 = scmp.lt.s32.totalorder %s176_s23, %s176_s23 }
   0xb   : > { %p2259_p6 = pnand %p2251_p4, %p1880_p5  ;;  %p2131_p12 = scmp.lt.s32.totalorder %s2122_s27, %s2122_s27 }
   0xd   : > { %p2113_p7 = pneg %p2259_p6  ;;  %p2132_p13 = por %p2131_p12, %p2130_p11 }
   0xf   : > { %p2125_p9 = pnand %p2123_p8, %p2113_p7 }
  0x11   : > { %p2126_p10 = pneg %p2125_p9 }
  0x13   : > { %p2133_p0 = pnand %p2132_p13, %p2126_p10 }
  0x15   : > { %2136 = shalt.err (!%p2133_p0)
}
  0x16   : > { %s2197_s28 = smov 256   ;;  %s2198_s29 = smov 16  }
  0x17   : > { %1883 = dma.hbm_to_vmem [thread:$0]  (!%p2259_p6), %s2349_s2, 15360, %s176_s23, [#allocation3], %s2197_s28, %s2197_s28, %s2198_s29  }
  0x18   : > { %s2148_s6 = scalar_lea.vmem %s189_s26, 4096  ;;  %p2156_p8 = scmp.lt.s32.totalorder %s189_s26, %s189_s26 }
  0x19   : > { %p2149_p1 = scmp.ne.s32.totalorder %s189_s26, %s2148_s6  ;;  %p2157_p9 = scmp.lt.s32.totalorder %s2148_s6, %s2148_s6 }
  0x1b   : > { %p2151_p2 = pnand %p2149_p1, %p2113_p7  ;;  %p2158_p11 = por %p2157_p9, %p2156_p8 }
  0x1d   : > { %p2152_p5 = pneg %p2151_p2 }
  0x1f   : > { %p2159_p10 = pnand %p2158_p11, %p2152_p5 }
  0x21   : > { %2162 = shalt.err (!%p2159_p10)
}
  0x22   : > { %s2199_s7 = smov 128   ;;  %s2200_s8 = smov 8  }
  0x23   : > { %1886 = dma.hbm_to_vmem [thread:$0]  (!%p2259_p6), %s2350_s3, 4096, %s189_s26, [#allocation5], %s2199_s7, %s2199_s7, %s2200_s8  }
  0x24   : > { %244 = sbr.rel (%p2247_p3) target bundleno = 588 (0x24c), region = 36 }
  0x29   : > { %2176 = dma.done.wait (%p2251_p4), [#allocation3], 15360  }
  0x2a   : > { %2178 = vsyncadd (%p2251_p4), [#allocation3], 4294951936 }
  0x2b   : > { %2180 = dma.done.wait (%p2251_p4), [#allocation5], 4096  }
  0x2c   : > { %2182 = vsyncadd (%p2251_p4), [#allocation5], 4294963200  ;;  %p305_p7 = scmp.lt.s32.totalorder %s2185_s15, 1  ;;  %v1922_v0 = vld [vmem:[#allocation2 + $0x224] ss:$16 sps:$4 sm:$0xff]   ;;  %vm668_vm1 = vcmask 261120  }
  0x2d   : > { %v1924_v1 = vld [vmem:[#allocation2 + $0x22c] ss:$16 sps:$4 sm:$0xff]   ;;  %672 = vmatprep.subr.bf16.mxu0 %v1922_v0  ;;  %v1926_v2 = vld [vmem:[#allocation2 + $0x220] ss:$16 sps:$4 sm:$0xff]   ;;  %v1927_v3 = vld [vmem:[#allocation2 + $0x228] ss:$16 sps:$4 sm:$0xff]  }
  0x2e   : > { %s2360_s15 = smov (!%p305_p7, %s2185_s15), 1  ;;  %715 = vmatprep.subr.bf16.mxu1 %v1924_v1  ;;  %v1928_v4 = vld [vmem:[#allocation2 + $0x204] ss:$16 sps:$4 sm:$0xff]   ;;  %673 = vmatpush1.bf16.msra.mxu0 %v1926_v2  ;;  %v1930_v5 = vld [vmem:[#allocation2 + $0x20c] ss:$16 sps:$4 sm:$0xff]   ;;  %vm1087_vm2 = vcmask 1046528  }
  0x2f   : > { %716 = vmatpush1.bf16.msra.mxu1 %v1927_v3  ;;  %v1932_v6 = vld [vmem:[#allocation2 + $0x200] ss:$16 sps:$4 sm:$0xff]   ;;  %674 = vmatprep.subr.bf16.mxu0 %v1928_v4  ;;  %v1933_v7 = vld [vmem:[#allocation2 + $0x208] ss:$16 sps:$4 sm:$0xff]   ;;  %v1934_v8 = vld [vmem:[#allocation2 + $0x1e4] ss:$16 sps:$4 sm:$0xff]  }
  0x30   : > { %717 = vmatprep.subr.bf16.mxu1 %v1930_v5  ;;  %v1936_v9 = vld [vmem:[#allocation2 + $0x1ec] ss:$16 sps:$4 sm:$0xff]   ;;  %v1938_v10 = vld [vmem:[#allocation2 + $0x1e0] ss:$16 sps:$4 sm:$0xff]   ;;  %v1939_v11 = vld [vmem:[#allocation2 + $0x1e8] ss:$16 sps:$4 sm:$0xff]  }
  0x31   : > { %v1940_v12 = vld [vmem:[#allocation2 + $0x1c4] ss:$16 sps:$4 sm:$0xff]   ;;  %v1942_v13 = vld [vmem:[#allocation2 + $0x1cc] ss:$16 sps:$4 sm:$0xff]   ;;  %v1944_v14 = vld [vmem:[#allocation2 + $0x1c0] ss:$16 sps:$4 sm:$0xff]  }
  0x32   : > { %675 = vmatpush1.bf16.msra.mxu0 %v1932_v6  ;;  %v1945_v15 = vld [vmem:[#allocation2 + $0x1c8] ss:$16 sps:$4 sm:$0xff]   ;;  %v1946_v16 = vld [vmem:[#allocation2 + $0x1a4] ss:$16 sps:$4 sm:$0xff]   ;;  %v1948_v17 = vld [vmem:[#allocation2 + $0x1ac] ss:$16 sps:$4 sm:$0xff]  }
  0x33   : > { %718 = vmatpush1.bf16.msra.mxu1 %v1933_v7  ;;  %676 = vmatprep.subr.bf16.mxu0 %v1934_v8  ;;  %v1950_v18 = vld [vmem:[#allocation2 + $0x1a0] ss:$16 sps:$4 sm:$0xff]   ;;  %v1951_v19 = vld [vmem:[#allocation2 + $0x1a8] ss:$16 sps:$4 sm:$0xff]   ;;  %v1952_v20 = vld [vmem:[#allocation2 + $0x184] ss:$16 sps:$4 sm:$0xff]  }
  0x34   : > { %719 = vmatprep.subr.bf16.mxu1 %v1936_v9  ;;  %v1954_v21 = vld [vmem:[#allocation2 + $0x18c] ss:$16 sps:$4 sm:$0xff]   ;;  %s1870_s11 = smul.u32 24, %s2360_s15  ;;  %v1956_v22 = vld [vmem:[#allocation2 + $0x180] ss:$16 sps:$4 sm:$0xff]   ;;  %s1799_s23 = sshll.u32 %s2360_s15, 4 }
  0x35   : > { %v1957_v23 = vld [vmem:[#allocation2 + $0x188] ss:$16 sps:$4 sm:$0xff]   ;;  %v1958_v24 = vld [vmem:[#allocation2 + $0x164] ss:$16 sps:$4 sm:$0xff]   ;;  %v1960_v25 = vld [vmem:[#allocation2 + $0x16c] ss:$16 sps:$4 sm:$0xff]   ;;  %s341_s26 = scalar_lea.vmem %s2351_s4, %s1799_s23 }
  0x36   : > { %677 = vmatpush1.bf16.msra.mxu0 %v1938_v10  ;;  %s1798_s12 = sadd.s32 16, %s1870_s11  ;;  %v1962_v26 = vld [vmem:[#allocation2 + $0x160] ss:$16 sps:$4 sm:$0xff]   ;;  %v1963_v27 = vld [vmem:[#allocation2 + $0x168] ss:$16 sps:$4 sm:$0xff]   ;;  %s313_s18 = scalar_lea.vmem %s2347_s0, %s1870_s11 }
  0x37   : > { %720 = vmatpush1.bf16.msra.mxu1 %v1939_v11  ;;  %678 = vmatprep.subr.bf16.mxu0 %v1940_v12  ;;  %v1964_v28 = vld [vmem:[#allocation2 + $0x144] ss:$16 sps:$4 sm:$0xff]   ;;  %s330_s22 = scalar_lea.vmem %s2348_s1, %s1798_s12  ;;  %v1966_v29 = vld [vmem:[#allocation2 + $0x14c] ss:$16 sps:$4 sm:$0xff]   ;;  %v1968_v30 = vld [vmem:[#allocation2 + $0x140] ss:$16 sps:$4 sm:$0xff]  }
  0x38   : > { %721 = vmatprep.subr.bf16.mxu1 %v1942_v13  ;;  %v1969_v31 = vld [vmem:[#allocation2 + $0x148] ss:$16 sps:$4 sm:$0xff]   ;;  %v346_v32 = vld [vmem:[%s330_s22] sm:$0xff]  ;;  %v1972_v38 = vld [vmem:[#allocation2 + $0x26c] ss:$16 sps:$4 sm:$0xff]  }
  0x39   : > { %v2302_v33 = vld [vmem:[%s313_s18] ss:$8 sps:$4 sm:$0xff]   ;;  %v2304_v34 = vld [vmem:[%s313_s18 + $0x4] ss:$8 sps:$4 sm:$0xff]   ;;  %v2306_v35 = vcombine.high %v346_v32, %v346_v32  ;;  %v1667_v36 = vcombine.low %v346_v32, %v346_v32  ;;  %vm442_vm0 = vsmask.f32 7424 }
  0x3a   : > { %679 = vmatpush1.bf16.msra.mxu0 %v1944_v14  ;;  %v1970_v37 = vld [vmem:[#allocation2 + $0x264] ss:$16 sps:$4 sm:$0xff]   ;;  %v446_v39 = vshll.u32 %v2302_v33, 16  ;;  %v1974_v40 = vld [vmem:[#allocation2 + $0x260] ss:$16 sps:$4 sm:$0xff]   ;;  %v456_v41 = vshrl.u32 %v2304_v34, 16 }
  0x3b   : > { %722 = vmatpush1.bf16.msra.mxu1 %v1945_v15  ;;  %680 = vmatprep.subr.bf16.mxu0 %v1946_v16  ;;  %v458_v42 = vshll.u32 %v2304_v34, 16  ;;  %v463_v43 = vshll.u32 %v2306_v35, 16  ;;  %v1975_v44 = vld [vmem:[#allocation2 + $0x268] ss:$16 sps:$4 sm:$0xff]   ;;  %v1976_v45 = vld [vmem:[#allocation2 + $0x244] ss:$16 sps:$4 sm:$0xff]  }
  0x3c   : > { %723 = vmatprep.subr.bf16.mxu1 %v1948_v17  ;;  %v444_v46 = vshrl.u32 %v2302_v33, 16  ;;  %v448_v49 = vrot.slane %v446_v39, 1  ;;  %v451_v50 = vshll.u32 %v1667_v36, 16  ;;  %v1978_v51 = vld [vmem:[#allocation2 + $0x24c] ss:$16 sps:$4 sm:$0xff]   ;;  %v1088_v53 = vrot.slane %v2302_v33, 1 }
  0x3d   : > { %v460_v47 = vrot.slane %v458_v42, 1  ;;  %v465_v48 = vrot.slane %v463_v43, 1  ;;  %v1980_v54 = vld [vmem:[#allocation2 + $0x240] ss:$16 sps:$4 sm:$0xff]   ;;  %v1981_v55 = vld [vmem:[#allocation2 + $0x248] ss:$16 sps:$4 sm:$0xff]  }
  0x3e   : > { %681 = vmatpush1.bf16.msra.mxu0 %v1950_v18  ;;  %v1089_v56 = vrot.slane %v1667_v36, 1  ;;  %v449_v58 = vor.u32 %v448_v49, %v444_v46  ;;  %v453_v59 = vrot.slane %v451_v50, 1  ;;  %v1989_v60 = vld [vmem:[#allocation2 + $0xe4] ss:$16 sps:$4 sm:$0xff]   ;;  %v1992_v61 = vld [vmem:[#allocation2 + $0xec] ss:$16 sps:$4 sm:$0xff]  }
  0x3f   : > { %724 = vmatpush1.bf16.msra.mxu1 %v1951_v19  ;;  %682 = vmatprep.subr.bf16.mxu0 %v1952_v20  ;;  %v461_v52 = vor.u32 %v460_v47, %v456_v41  ;;  %v1987_v63 = vld [vmem:[#allocation2 + $0xe0] ss:$16 sps:$4 sm:$0xff]   ;;  %v1990_v0 = vld [vmem:[#allocation2 + $0xe8] ss:$16 sps:$4 sm:$0xff]   ;;  %v1995_v2 = vld [vmem:[#allocation2 + $0xc4] ss:$16 sps:$4 sm:$0xff]  }
  0x40   : > { %725 = vmatprep.subr.bf16.mxu1 %v1954_v21  ;;  %v2316_v62 = vsel %vm1087_vm2, %v1088_v53, %v1089_v56  ;;  %v454_v1 = vsel %vm442_vm0, %v449_v58, %v453_v59  ;;  %v1998_v3 = vld [vmem:[#allocation2 + $0xcc] ss:$16 sps:$4 sm:$0xff]   ;;  %v1993_v4 = vld [vmem:[#allocation2 + $0xc0] ss:$16 sps:$4 sm:$0xff]   ;;  %v1996_v5 = vld [vmem:[#allocation2 + $0xc8] ss:$16 sps:$4 sm:$0xff]  }
  0x41   : > { %v466_v57 = vsel %vm442_vm0, %v461_v52, %v465_v48  ;;  %v2001_v6 = vld [vmem:[#allocation2 + $0xa4] ss:$16 sps:$4 sm:$0xff]   ;;  %v2004_v7 = vld [vmem:[#allocation2 + $0xac] ss:$16 sps:$4 sm:$0xff]   ;;  %v1999_v8 = vld [vmem:[#allocation2 + $0xa0] ss:$16 sps:$4 sm:$0xff]  }
  0x42   : > { %683 = vmatpush1.bf16.msra.mxu0 %v1956_v22  ;;  %1709 = vmatprep.mubr.msk.bf16.mxu0 %vm668_vm1, %v466_v57  ;;  %v2002_v9 = vld [vmem:[#allocation2 + $0xa8] ss:$16 sps:$4 sm:$0xff]   ;;  %v2007_v10 = vld [vmem:[#allocation2 + $0x84] ss:$16 sps:$4 sm:$0xff]   ;;  %v2010_v11 = vld [vmem:[#allocation2 + $0x8c] ss:$16 sps:$4 sm:$0xff]  }
  0x43   : > { %726 = vmatpush1.bf16.msra.mxu1 %v1957_v23  ;;  %684 = vmatprep.subr.bf16.mxu0 %v1958_v24  ;;  %v2005_v12 = vld [vmem:[#allocation2 + $0x80] ss:$16 sps:$4 sm:$0xff]   ;;  %v2008_v13 = vld [vmem:[#allocation2 + $0x88] ss:$16 sps:$4 sm:$0xff]   ;;  %v2013_v14 = vld [vmem:[#allocation2 + $0x64] ss:$16 sps:$4 sm:$0xff]  }
  0x44   : > { %727 = vmatprep.subr.bf16.mxu1 %v1960_v25  ;;  %1710 = vmatprep.mubr.msk.bf16.mxu1 %vm668_vm1, %v466_v57  ;;  %v2016_v15 = vld [vmem:[#allocation2 + $0x6c] ss:$16 sps:$4 sm:$0xff]   ;;  %v2011_v16 = vld [vmem:[#allocation2 + $0x60] ss:$16 sps:$4 sm:$0xff]   ;;  %v2014_v17 = vld [vmem:[#allocation2 + $0x68] ss:$16 sps:$4 sm:$0xff]  }
  0x45   : > { %v2019_v18 = vld [vmem:[#allocation2 + $0x44] ss:$16 sps:$4 sm:$0xff]   ;;  %v2022_v19 = vld [vmem:[#allocation2 + $0x4c] ss:$16 sps:$4 sm:$0xff]   ;;  %v2017_v20 = vld [vmem:[#allocation2 + $0x40] ss:$16 sps:$4 sm:$0xff]  }
  0x46   : > { %685 = vmatpush1.bf16.msra.mxu0 %v1962_v26  ;;  %v2020_v21 = vld [vmem:[#allocation2 + $0x48] ss:$16 sps:$4 sm:$0xff]   ;;  %v2025_v22 = vld [vmem:[#allocation2 + $0x24] ss:$16 sps:$4 sm:$0xff]   ;;  %v2028_v23 = vld [vmem:[#allocation2 + $0x2c] ss:$16 sps:$4 sm:$0xff]  }
  0x47   : > { %728 = vmatpush1.bf16.msra.mxu1 %v1963_v27  ;;  %686 = vmatprep.subr.bf16.mxu0 %v1964_v28  ;;  %v2023_v24 = vld [vmem:[#allocation2 + $0x20] ss:$16 sps:$4 sm:$0xff]   ;;  %v2026_v25 = vld [vmem:[#allocation2 + $0x28] ss:$16 sps:$4 sm:$0xff]   ;;  %v2031_v26 = vld [vmem:[#allocation2 + $0x4] ss:$16 sps:$4 sm:$0xff]  }
  0x48   : > { %729 = vmatprep.subr.bf16.mxu1 %v1966_v29  ;;  %v2034_v27 = vld [vmem:[#allocation2 + $0xc] ss:$16 sps:$4 sm:$0xff]   ;;  %v2029_v28 = vld [vmem:[#allocation2] ss:$16 sps:$4 sm:$0xff]   ;;  %v2032_v29 = vld [vmem:[#allocation2 + $0x8] ss:$16 sps:$4 sm:$0xff]  }
  0x49   : > { %v2035_v32 = vld [vmem:[#allocation2 + $0x120] ss:$16 sps:$4 sm:$0xff]   ;;  %v2038_v36 = vld [vmem:[#allocation2 + $0x128] ss:$16 sps:$4 sm:$0xff]   ;;  %v2049_v41 = vld [vmem:[#allocation2 + $0x364] ss:$16 sps:$4 sm:$0xff]  }
  0x4a   : > { %687 = vmatpush1.bf16.msra.mxu0 %v1968_v30  ;;  %v2037_v30 = vld [vmem:[#allocation2 + $0x124] ss:$16 sps:$4 sm:$0xff]   ;;  %v2041_v39 = vld [vmem:[#allocation2 + $0x100] ss:$16 sps:$4 sm:$0xff]   ;;  %v2052_v42 = vld [vmem:[#allocation2 + $0x36c] ss:$16 sps:$4 sm:$0xff]  }
  0x4b   : > { %730 = vmatpush1.bf16.msra.mxu1 %v1969_v31  ;;  %700 = vmatprep.subr.bf16.mxu0 %v1970_v37  ;;  %v2040_v31 = vld [vmem:[#allocation2 + $0x12c] ss:$16 sps:$4 sm:$0xff]   ;;  %v2043_v37 = vld [vmem:[#allocation2 + $0x104] ss:$16 sps:$4 sm:$0xff]   ;;  %v1091_v43 = vrot.slane %v2304_v34, 1  ;;  %v1092_v46 = vrot.slane %v2306_v35, 1 }
  0x4c   : > { %743 = vmatprep.subr.bf16.mxu1 %v1972_v38  ;;  %v2046_v38 = vld [vmem:[#allocation2 + $0x10c] ss:$16 sps:$4 sm:$0xff]   ;;  %v2055_v47 = vld [vmem:[#allocation2 + $0x344] ss:$16 sps:$4 sm:$0xff]   ;;  %v2053_v50 = vld [vmem:[#allocation2 + $0x340] ss:$16 sps:$4 sm:$0xff]  }
  0x4d   : > { %v2058_v48 = vld [vmem:[#allocation2 + $0x34c] ss:$16 sps:$4 sm:$0xff]   ;;  %v1093_v49 = vsel %vm1087_vm2, %v1091_v43, %v1092_v46  ;;  %v2059_v52 = vld [vmem:[#allocation2 + $0x320] ss:$16 sps:$4 sm:$0xff]   ;;  %v2062_v53 = vld [vmem:[#allocation2 + $0x328] ss:$16 sps:$4 sm:$0xff]  }
  0x4e   : > { %701 = vmatpush2.bf16.msra.mxu0 %v1974_v40  ;;  %v2044_v40 = vld [vmem:[#allocation2 + $0x108] ss:$16 sps:$4 sm:$0xff]   ;;  %v2064_v35 = vld [vmem:[#allocation2 + $0x32c] ss:$16 sps:$4 sm:$0xff]   ;;  %v2073_v57 = vld [vmem:[#allocation2 + $0x2e4] ss:$16 sps:$4 sm:$0xff]  }
  0x4f   : > { %744 = vmatpush2.bf16.msra.mxu1 %v1975_v44  ;;  %702 = vmatprep.subr.bf16.mxu0 %v1976_v45  ;;  %v2047_v44 = vld [vmem:[#allocation2 + $0x360] ss:$16 sps:$4 sm:$0xff]   ;;  %v2050_v45 = vld [vmem:[#allocation2 + $0x368] ss:$16 sps:$4 sm:$0xff]   ;;  %v2076_v58 = vld [vmem:[#allocation2 + $0x2ec] ss:$16 sps:$4 sm:$0xff]  }
  0x50   : > { %745 = vmatprep.subr.bf16.mxu1 %v1978_v51  ;;  %v2061_v51 = vld [vmem:[#allocation2 + $0x324] ss:$16 sps:$4 sm:$0xff]   ;;  %v2068_v56 = vld [vmem:[#allocation2 + $0x308] ss:$16 sps:$4 sm:$0xff]   ;;  %v2071_v59 = vld [vmem:[#allocation2 + $0x2e0] ss:$16 sps:$4 sm:$0xff]  }
  0x51   : > { %v1408_v43 = vld [vmem:[#allocation4 + $0x20] sm:$0xff]  ;;  %v1422_v46 = vld [vmem:[#allocation4 + $0x90] sm:$0xff] }
  0x52   : > { %703 = vmatpush2.bf16.msra.mxu0 %v1980_v54  ;;  %v2070_v54 = vld [vmem:[#allocation2 + $0x30c] ss:$16 sps:$4 sm:$0xff]  }
  0x53   : > { %746 = vmatpush2.bf16.msra.mxu1 %v1981_v55  ;;  %960 = vmatprep.subr.bf16.mxu0 %v1989_v60  ;;  %v2065_v55 = vld [vmem:[#allocation2 + $0x300] ss:$16 sps:$4 sm:$0xff]   ;;  %v2074_v60 = vld [vmem:[#allocation2 + $0x2e8] ss:$16 sps:$4 sm:$0xff]  }
  0x54   : > { %1003 = vmatprep.subr.bf16.mxu1 %v1992_v61  ;;  %v2079_v61 = vld [vmem:[#allocation2 + $0x2c4] ss:$16 sps:$4 sm:$0xff]  }
  0x55   : > { %705 = vmatmul.mubr.bf16.vlgmr.msra.gmra.mxu0 %v454_v1 }
  0x56   : > { %748 = vmatmul.mubr.bf16.vlgmr.msra.gmra.mxu1 %v454_v1  ;;  %961 = vmatpush1.bf16.msra.mxu0 %v1987_v63  ;;  %v2082_v63 = vld [vmem:[#allocation2 + $0x2cc] ss:$16 sps:$4 sm:$0xff]   ;;  %v2080_v1 = vld [vmem:[#allocation2 + $0x2c8] ss:$16 sps:$4 sm:$0xff]  }
  0x57   : > { %1004 = vmatpush1.bf16.msra.mxu1 %v1990_v0  ;;  %962 = vmatprep.subr.bf16.mxu0 %v1995_v2  ;;  %v2077_v0 = vld [vmem:[#allocation2 + $0x2c0] ss:$16 sps:$4 sm:$0xff]   ;;  %v2085_v2 = vld [vmem:[#allocation2 + $0x2a4] ss:$16 sps:$4 sm:$0xff]  }
  0x58   : > { %1005 = vmatprep.subr.bf16.mxu1 %v1998_v3  ;;  %1751 = vmatprep.mubr.msk.bf16.mxu0 %vm668_vm1, %v2304_v34  ;;  %v2088_v3 = vld [vmem:[#allocation2 + $0x2ac] ss:$16 sps:$4 sm:$0xff]  }
  0x59   : > { %1752 = vmatprep.mubr.msk.bf16.mxu1 %vm668_vm1, %v2304_v34  ;;  %v2056_v34 = vld [vmem:[#allocation2 + $0x348] ss:$16 sps:$4 sm:$0xff]  }
  0x5a   : > { %963 = vmatpush1.bf16.msra.mxu0 %v1993_v4  ;;  %v2083_v4 = vld [vmem:[#allocation2 + $0x2a0] ss:$16 sps:$4 sm:$0xff]  }
  0x5b   : > { %1006 = vmatpush1.bf16.msra.mxu1 %v1996_v5  ;;  %964 = vmatprep.subr.bf16.mxu0 %v2001_v6  ;;  %v2086_v5 = vld [vmem:[#allocation2 + $0x2a8] ss:$16 sps:$4 sm:$0xff]   ;;  %v2091_v6 = vld [vmem:[#allocation2 + $0x284] ss:$16 sps:$4 sm:$0xff]  }
  0x5c   : > { %1007 = vmatprep.subr.bf16.mxu1 %v2004_v7  ;;  %v2094_v7 = vld [vmem:[#allocation2 + $0x28c] ss:$16 sps:$4 sm:$0xff]  }
  0x5e   : > { %965 = vmatpush1.bf16.msra.mxu0 %v1999_v8  ;;  %v2089_v8 = vld [vmem:[#allocation2 + $0x280] ss:$16 sps:$4 sm:$0xff]  }
  0x5f   : > { %1008 = vmatpush1.bf16.msra.mxu1 %v2002_v9  ;;  %966 = vmatprep.subr.bf16.mxu0 %v2007_v10  ;;  %v2092_v9 = vld [vmem:[#allocation2 + $0x288] ss:$16 sps:$4 sm:$0xff]   ;;  %v2097_v10 = vld [vmem:[#allocation2 + $0x3a4] ss:$16 sps:$4 sm:$0xff]  }
  0x60   : > { %1009 = vmatprep.subr.bf16.mxu1 %v2010_v11  ;;  %v2100_v11 = vld [vmem:[#allocation2 + $0x3ac] ss:$16 sps:$4 sm:$0xff]  }
  0x62   : > { %967 = vmatpush1.bf16.msra.mxu0 %v2005_v12  ;;  %v2095_v12 = vld [vmem:[#allocation2 + $0x3a0] ss:$16 sps:$4 sm:$0xff]  }
  0x63   : > { %1010 = vmatpush1.bf16.msra.mxu1 %v2008_v13  ;;  %968 = vmatprep.subr.bf16.mxu0 %v2013_v14  ;;  %v2098_v13 = vld [vmem:[#allocation2 + $0x3a8] ss:$16 sps:$4 sm:$0xff]   ;;  %v2103_v14 = vld [vmem:[#allocation2 + $0x384] ss:$16 sps:$4 sm:$0xff]  }
  0x64   : > { %1011 = vmatprep.subr.bf16.mxu1 %v2016_v15  ;;  %v2106_v15 = vld [vmem:[#allocation2 + $0x38c] ss:$16 sps:$4 sm:$0xff]  }
  0x66   : > { %969 = vmatpush1.bf16.msra.mxu0 %v2011_v16  ;;  %v2101_v16 = vld [vmem:[#allocation2 + $0x380] ss:$16 sps:$4 sm:$0xff]  }
  0x67   : > { %1012 = vmatpush1.bf16.msra.mxu1 %v2014_v17  ;;  %970 = vmatprep.subr.bf16.mxu0 %v2019_v18  ;;  %v2104_v17 = vld [vmem:[#allocation2 + $0x388] ss:$16 sps:$4 sm:$0xff]  }
  0x68   : > { %1013 = vmatprep.subr.bf16.mxu1 %v2022_v19  ;;  %v1435_v18 = vld [vmem:[#allocation4 + $0xf8] sm:$0xff] }
  0x69   : > { %v1419_v19 = vld [vmem:[#allocation4 + $0x78] sm:$0xff] }
  0x6a   : > { %971 = vmatpush1.bf16.msra.mxu0 %v2017_v20  ;;  %v1434_v20 = vld [vmem:[#allocation4 + $0xf0] sm:$0xff] }
  0x6b   : > { %1014 = vmatpush1.bf16.msra.mxu1 %v2020_v21  ;;  %972 = vmatprep.subr.bf16.mxu0 %v2025_v22  ;;  %v1418_v21 = vld [vmem:[#allocation4 + $0x70] sm:$0xff]  ;;  %v1433_v22 = vld [vmem:[#allocation4 + $0xe8] sm:$0xff] }
  0x6c   : > { %1015 = vmatprep.subr.bf16.mxu1 %v2028_v23  ;;  %v1417_v23 = vld [vmem:[#allocation4 + $0x68] sm:$0xff] }
  0x6e   : > { %973 = vmatpush1.bf16.msra.mxu0 %v2023_v24  ;;  %v1432_v24 = vld [vmem:[#allocation4 + $0xe0] sm:$0xff] }
  0x6f   : > { %1016 = vmatpush1.bf16.msra.mxu1 %v2026_v25  ;;  %974 = vmatprep.subr.bf16.mxu0 %v2031_v26  ;;  %v1416_v25 = vld [vmem:[#allocation4 + $0x60] sm:$0xff]  ;;  %v1415_v26 = vld [vmem:[#allocation4 + $0x58] sm:$0xff] }
  0x70   : > { %1017 = vmatprep.subr.bf16.mxu1 %v2034_v27  ;;  %v1430_v27 = vld [vmem:[#allocation4 + $0xd0] sm:$0xff] }
  0x72   : > { %975 = vmatpush1.bf16.msra.mxu0 %v2029_v28  ;;  %v1414_v28 = vld [vmem:[#allocation4 + $0x50] sm:$0xff] }
  0x73   : > { %1018 = vmatpush1.bf16.msra.mxu1 %v2032_v29  ;;  %988 = vmatprep.subr.bf16.mxu0 %v2037_v30  ;;  %v1429_v29 = vld [vmem:[#allocation4 + $0xc8] sm:$0xff] }
  0x74   : > { %1031 = vmatprep.subr.bf16.mxu1 %v2040_v31  ;;  %v1413_v30 = vld [vmem:[#allocation4 + $0x48] sm:$0xff]  ;;  %v1428_v31 = vld [vmem:[#allocation4 + $0xc0] sm:$0xff] }
  0x76   : > { %989 = vmatpush2.bf16.msra.mxu0 %v2035_v32  ;;  %v1412_v32 = vld [vmem:[#allocation4 + $0x40] sm:$0xff] }
  0x77   : > { %1032 = vmatpush2.bf16.msra.mxu1 %v2038_v36  ;;  %990 = vmatprep.subr.bf16.mxu0 %v2043_v37  ;;  %v1427_v36 = vld [vmem:[#allocation4 + $0xb8] sm:$0xff] }
  0x78   : > { %1033 = vmatprep.subr.bf16.mxu1 %v2046_v38  ;;  %v1411_v37 = vld [vmem:[#allocation4 + $0x38] sm:$0xff]  ;;  %v1426_v38 = vld [vmem:[#allocation4 + $0xb0] sm:$0xff] }
  0x7a   : > { %991 = vmatpush2.bf16.msra.mxu0 %v2041_v39  ;;  %v1410_v39 = vld [vmem:[#allocation4 + $0x30] sm:$0xff] }
  0x7b   : > { %1034 = vmatpush2.bf16.msra.mxu1 %v2044_v40  ;;  %1298 = vmatprep.subr.bf16.mxu0 %v2049_v41  ;;  %v1425_v40 = vld [vmem:[#allocation4 + $0xa8] sm:$0xff] }
  0x7c   : > { %1341 = vmatprep.subr.bf16.mxu1 %v2052_v42  ;;  %v1409_v41 = vld [vmem:[#allocation4 + $0x28] sm:$0xff]  ;;  %v1424_v42 = vld [vmem:[#allocation4 + $0xa0] sm:$0xff] }
  0x7d   : > { %993 = vmatmul.mubr.bf16.vlgmr.msra.gmra.mxu0 %v2302_v33 }
  0x7e   : > { %1036 = vmatmul.mubr.bf16.vlgmr.msra.gmra.mxu1 %v2302_v33  ;;  %1299 = vmatpush1.bf16.msra.mxu0 %v2047_v44  ;;  %v2067_v33 = vld [vmem:[#allocation2 + $0x304] ss:$16 sps:$4 sm:$0xff]   ;;  %v1423_v44 = vld [vmem:[#allocation4 + $0x98] sm:$0xff] }
  0x7f   : > { %1342 = vmatpush1.bf16.msra.mxu1 %v2050_v45  ;;  %1300 = vmatprep.subr.bf16.mxu0 %v2055_v47  ;;  %v1407_v45 = vld [vmem:[#allocation4 + $0x18] sm:$0xff]  ;;  %v1406_v47 = vld [vmem:[#allocation4 + $0x10] sm:$0xff] }
  0x80   : > { %1343 = vmatprep.subr.bf16.mxu1 %v2058_v48  ;;  %1793 = vmatprep.mubr.msk.bf16.mxu0 %vm668_vm1, %v1093_v49  ;;  %v1421_v48 = vld [vmem:[#allocation4 + $0x88] sm:$0xff] }
  0x81   : > { %1794 = vmatprep.mubr.msk.bf16.mxu1 %vm668_vm1, %v1093_v49  ;;  %v1405_v49 = vld [vmem:[#allocation4 + $0x8] sm:$0xff] }
  0x82   : > { %1301 = vmatpush1.bf16.msra.mxu0 %v2053_v50  ;;  %v1420_v50 = vld [vmem:[#allocation4 + $0x80] sm:$0xff] }
  0x83   : > { %1344 = vmatpush1.bf16.msra.mxu1 %v2056_v34  ;;  %1302 = vmatprep.subr.bf16.mxu0 %v2061_v51  ;;  %v1404_v34 = vld [vmem:[#allocation4] sm:$0xff] }
  0x84   : > { %1345 = vmatprep.subr.bf16.mxu1 %v2064_v35 }
  0x86   : > { %1303 = vmatpush1.bf16.msra.mxu0 %v2059_v52 }
  0x87   : > { %1346 = vmatpush1.bf16.msra.mxu1 %v2062_v53  ;;  %1304 = vmatprep.subr.bf16.mxu0 %v2067_v33 }
  0x88   : > { %1347 = vmatprep.subr.bf16.mxu1 %v2070_v54 }
  0x8a   : > { %1305 = vmatpush1.bf16.msra.mxu0 %v2065_v55 }
  0x8b   : > { %1348 = vmatpush1.bf16.msra.mxu1 %v2068_v56  ;;  %1306 = vmatprep.subr.bf16.mxu0 %v2073_v57 }
  0x8c   : > { %1349 = vmatprep.subr.bf16.mxu1 %v2076_v58 }
  0x8e   : > { %1307 = vmatpush1.bf16.msra.mxu0 %v2071_v59 }
  0x8f   : > { %1350 = vmatpush1.bf16.msra.mxu1 %v2074_v60  ;;  %1308 = vmatprep.subr.bf16.mxu0 %v2079_v61 }
  0x90   : > { %1351 = vmatprep.subr.bf16.mxu1 %v2082_v63 }
  0x92   : > { %1309 = vmatpush1.bf16.msra.mxu0 %v2077_v0 }
  0x93   : > { %1352 = vmatpush1.bf16.msra.mxu1 %v2080_v1  ;;  %1310 = vmatprep.subr.bf16.mxu0 %v2085_v2 }
  0x94   : > { %1353 = vmatprep.subr.bf16.mxu1 %v2088_v3 }
  0x96   : > { %1311 = vmatpush1.bf16.msra.mxu0 %v2083_v4 }
  0x97   : > { %1354 = vmatpush1.bf16.msra.mxu1 %v2086_v5  ;;  %1312 = vmatprep.subr.bf16.mxu0 %v2091_v6 }
  0x98   : > { %1355 = vmatprep.subr.bf16.mxu1 %v2094_v7 }
  0x9a   : > { %1313 = vmatpush1.bf16.msra.mxu0 %v2089_v8 }
  0x9b   : > { %1356 = vmatpush1.bf16.msra.mxu1 %v2092_v9  ;;  %1326 = vmatprep.subr.bf16.mxu0 %v2097_v10 }
  0x9c   : > { %1369 = vmatprep.subr.bf16.mxu1 %v2100_v11 }
  0x9e   : > { %1327 = vmatpush2.bf16.msra.mxu0 %v2095_v12 }
  0x9f   : > { %1370 = vmatpush2.bf16.msra.mxu1 %v2098_v13  ;;  %1328 = vmatprep.subr.bf16.mxu0 %v2103_v14 }
  0xa0   : > { %1371 = vmatprep.subr.bf16.mxu1 %v2106_v15 }
  0xa2   : > { %1329 = vmatpush2.bf16.msra.mxu0 %v2101_v16 }
  0xa3   : > { %1372 = vmatpush2.bf16.msra.mxu1 %v2104_v17  ;;  %1800 = vmatprep.subr.mxu0 %v1435_v18 }
  0xa4   : > { %1838 = vmatprep.subr.mxu1 %v1435_v18 }
  0xa5   : > { %1331 = vmatmul.mubr.bf16.vlgmr.msra.gmra.mxu0 %v2316_v62 }
  0xa6   : > { %1374 = vmatmul.mubr.bf16.vlgmr.msra.gmra.mxu1 %v2316_v62  ;;  %1801 = vmatpush3.msra.mxu0 %v1419_v19  ;;  %v1431_v62 = vld [vmem:[#allocation4 + $0xd8] sm:$0xff] }
  0xa7   : > { %1854 = vmatpush3.msra.mxu1 %v1419_v19  ;;  %1802 = vmatprep.subr.mxu0 %v1434_v20 }
  0xa8   : > { %1839 = vmatprep.subr.mxu1 %v1434_v20  ;;  %1803 = vmatpush3.msra.mxu0 %v1418_v21 }
  0xa9   : > { %1855 = vmatpush3.msra.mxu1 %v1418_v21  ;;  %1804 = vmatprep.subr.mxu0 %v1433_v22 }
  0xaa   : > { %1840 = vmatprep.subr.mxu1 %v1433_v22  ;;  %1805 = vmatpush3.msra.mxu0 %v1417_v23 }
  0xab   : > { %1856 = vmatpush3.msra.mxu1 %v1417_v23  ;;  %1806 = vmatprep.subr.mxu0 %v1432_v24 }
  0xac   : > { %1841 = vmatprep.subr.mxu1 %v1432_v24  ;;  %1807 = vmatpush3.msra.mxu0 %v1416_v25 }
  0xad   : > { %1857 = vmatpush3.msra.mxu1 %v1416_v25  ;;  %1808 = vmatprep.subr.mxu0 %v1431_v62 }
  0xae   : > { %1842 = vmatprep.subr.mxu1 %v1431_v62  ;;  %1809 = vmatpush3.msra.mxu0 %v1415_v26 }
  0xaf   : > { %1858 = vmatpush3.msra.mxu1 %v1415_v26  ;;  %1810 = vmatprep.subr.mxu0 %v1430_v27 }
  0xb0   : > { %1843 = vmatprep.subr.mxu1 %v1430_v27  ;;  %1811 = vmatpush3.msra.mxu0 %v1414_v28 }
  0xb1   : > { %1859 = vmatpush3.msra.mxu1 %v1414_v28  ;;  %1812 = vmatprep.subr.mxu0 %v1429_v29 }
  0xb2   : > { %1844 = vmatprep.subr.mxu1 %v1429_v29  ;;  %1813 = vmatpush3.msra.mxu0 %v1413_v30 }
  0xb3   : > { %1860 = vmatpush3.msra.mxu1 %v1413_v30  ;;  %1814 = vmatprep.subr.mxu0 %v1428_v31 }
  0xb4   : > { %1845 = vmatprep.subr.mxu1 %v1428_v31  ;;  %1815 = vmatpush3.msra.mxu0 %v1412_v32 }
  0xb5   : > { %1861 = vmatpush3.msra.mxu1 %v1412_v32  ;;  %1816 = vmatprep.subr.mxu0 %v1427_v36 }
  0xb6   : > { %1846 = vmatprep.subr.mxu1 %v1427_v36  ;;  %1817 = vmatpush3.msra.mxu0 %v1411_v37 }
  0xb7   : > { %1862 = vmatpush3.msra.mxu1 %v1411_v37  ;;  %1818 = vmatprep.subr.mxu0 %v1426_v38 }
  0xb8   : > { %1847 = vmatprep.subr.mxu1 %v1426_v38  ;;  %1819 = vmatpush3.msra.mxu0 %v1410_v39 }
  0xb9   : > { %1863 = vmatpush3.msra.mxu1 %v1410_v39  ;;  %1820 = vmatprep.subr.mxu0 %v1425_v40 }
  0xba   : > { %1848 = vmatprep.subr.mxu1 %v1425_v40  ;;  %1821 = vmatpush3.msra.mxu0 %v1409_v41 }
  0xbb   : > { %1864 = vmatpush3.msra.mxu1 %v1409_v41  ;;  %1822 = vmatprep.subr.mxu0 %v1424_v42 }
  0xbc   : > { %1849 = vmatprep.subr.mxu1 %v1424_v42  ;;  %1823 = vmatpush3.msra.mxu0 %v1408_v43 }
  0xbd   : > { %1865 = vmatpush3.msra.mxu1 %v1408_v43  ;;  %1824 = vmatprep.subr.mxu0 %v1423_v44 }
  0xbe   : > { %1850 = vmatprep.subr.mxu1 %v1423_v44  ;;  %1825 = vmatpush3.msra.mxu0 %v1407_v45 }
  0xbf   : > { %1866 = vmatpush3.msra.mxu1 %v1407_v45  ;;  %1826 = vmatprep.subr.mxu0 %v1422_v46 }
  0xc0   : > { %1851 = vmatprep.subr.mxu1 %v1422_v46  ;;  %1827 = vmatpush3.msra.mxu0 %v1406_v47 }
  0xc1   : > { %1867 = vmatpush3.msra.mxu1 %v1406_v47  ;;  %1828 = vmatprep.subr.mxu0 %v1421_v48 }
  0xc2   : > { %1852 = vmatprep.subr.mxu1 %v1421_v48  ;;  %1829 = vmatpush3.msra.mxu0 %v1405_v49 }
  0xc3   : > { %1868 = vmatpush3.msra.mxu1 %v1405_v49  ;;  %1830 = vmatprep.subr.mxu0 %v1420_v50 }
  0xc4   : > { %1853 = vmatprep.subr.mxu1 %v1420_v50  ;;  %1831 = vmatpush3.msra.mxu0 %v1404_v34 }
  0xc5   : > { %1869 = vmatpush3.msra.mxu1 %v1404_v34 }
 0x115   : > { %v706_v51 = vpop.f32.mrf.mxu0 }
 0x116   : > { %v749_v35 = vpop.f32.mrf.mxu1 }
 0x117   : > { %v708_v52 = vpop.f32.mrf.mxu0 }
 0x118   : > { %v751_v53 = vpop.f32.mrf.mxu1 }
 0x119   : > { %v710_v33 = vpop.f32.mrf.mxu0 }
 0x11a   : > { %v753_v54 = vpop.f32.mrf.mxu1 }
 0x11b   : > { %v712_v55 = vpop.f32.mrf.mxu0 }
 0x11c   : > { %v755_v56 = vpop.f32.mrf.mxu1 }
 0x13d   : > { %v994_v57 = vpop.f32.mrf.mxu0 }
 0x13e   : > { %v1037_v58 = vpop.f32.mrf.mxu1  ;;  %v995_v2 = vadd.f32 %v994_v57, %v706_v51 }
 0x13f   : > { %v996_v59 = vpop.f32.mrf.mxu0  ;;  %v1038_v3 = vadd.f32 %v1037_v58, %v749_v35 }
 0x140   : > { %v1039_v60 = vpop.f32.mrf.mxu1  ;;  %v997_v6 = vadd.f32 %v996_v59, %v708_v52 }
 0x141   : > { %v998_v61 = vpop.f32.mrf.mxu0  ;;  %v1040_v7 = vadd.f32 %v1039_v60, %v751_v53 }
 0x142   : > { %v1041_v63 = vpop.f32.mrf.mxu1  ;;  %v999_v12 = vadd.f32 %v998_v61, %v710_v33 }
 0x143   : > { %v1000_v0 = vpop.f32.mrf.mxu0  ;;  %v1042_v15 = vadd.f32 %v1041_v63, %v753_v54 }
 0x144   : > { %v1043_v1 = vpop.f32.mrf.mxu1  ;;  %v1001_v16 = vadd.f32 %v1000_v0, %v712_v55 }
 0x145   : > { %v1044_v21 = vadd.f32 %v1043_v1, %v755_v56 }
 0x165   : > { %v1332_v4 = vpop.f32.mrf.mxu0 }
 0x166   : > { %v1375_v5 = vpop.f32.mrf.mxu1  ;;  %v1384_v8 = vadd.f32 %v1332_v4, %v995_v2 }
 0x167   : > { %v1386_v9 = vadd.f32 %v1375_v5, %v1038_v3  ;;  %v1334_v10 = vpop.f32.mrf.mxu0 }
 0x168   : > { %v1377_v11 = vpop.f32.mrf.mxu1  ;;  %v1385_v13 = vadd.f32 %v1334_v10, %v997_v6  ;;  %v1392_v17 = vmul.f32 %v1384_v8, %v1384_v8 }
 0x169   : > { %v1387_v14 = vadd.f32 %v1377_v11, %v1040_v7  ;;  %v1396_v18 = vmul.f32 %v1386_v9, %v1386_v9  ;;  %v1336_v19 = vpop.f32.mrf.mxu0 }
 0x16a   : > { %v1379_v20 = vpop.f32.mrf.mxu1  ;;  %v1393_v22 = vmul.f32 %v1385_v13, %v1385_v13  ;;  %v1388_v24 = vadd.f32 %v1336_v19, %v999_v12 }
 0x16b   : > { %v1397_v23 = vmul.f32 %v1387_v14, %v1387_v14  ;;  %v1390_v25 = vadd.f32 %v1379_v20, %v1042_v15  ;;  %v1338_v62 = vpop.f32.mrf.mxu0  ;;  %v1400_v30 = vadd.f32 %v1396_v18, %v1392_v17 }
 0x16c   : > { %v1381_v26 = vpop.f32.mrf.mxu1  ;;  %v1389_v28 = vadd.f32 %v1338_v62, %v1001_v16  ;;  %v1394_v31 = vmul.f32 %v1388_v24, %v1388_v24 }
 0x16d   : > { %v1401_v27 = vadd.f32 %v1397_v23, %v1393_v22  ;;  %v1391_v29 = vadd.f32 %v1381_v26, %v1044_v21  ;;  %v1398_v32 = vmul.f32 %v1390_v25, %v1390_v25 }
 0x16e   : > { %v1395_v36 = vmul.f32 %v1389_v28, %v1389_v28 }
 0x16f   : > { %v1399_v37 = vmul.f32 %v1391_v29, %v1391_v29  ;;  %1500 = vmatprep.mubr.f32.mxu0 %v1401_v27  ;;  %v1402_v39 = vadd.f32 %v1398_v32, %v1394_v31 }
 0x170   : > { %1501 = vmatmul.mubr.f32.vlgmr.msra.gmra.mxu0 %v1400_v30 }
 0x171   : > { %v1403_v38 = vadd.f32 %v1399_v37, %v1395_v36 }
 0x173   : > { %1505 = vmatprep.mubr.f32.mxu1 %v1403_v38 }
 0x174   : > { %1506 = vmatmul.mubr.f32.vlgmr.msra.gmra.mxu1 %v1402_v39 }
 0x230   : > { %v1832_v40 = vpop.f32.mrf.mxu0 }
 0x232   : > { %v1833_v41 = vpop.f32.mrf.mxu0 }
 0x233   : > { %v1834_v42 = vadd.f32 %v1833_v41, %v1832_v40 }
 0x234   : > { %v1835_v43 = vpop.f32.mrf.mxu1 }
 0x235   : > { %v1511_v44 = vmax.f32 %v1834_v42, 1.1920929e-07 }
 0x236   : > { %v1836_v45 = vpop.f32.mrf.mxu1 }
 0x237   : > { %2107 = vlog2.f32 %v1511_v44  ;;  %v1837_v46 = vadd.f32 %v1836_v45, %v1835_v43 }
 0x239   : > { %v1512_v47 = vmax.f32 %v1837_v46, 1.1920929e-07 }
 0x23b   : > { %2109 = vlog2.f32 %v1512_v47 }
 0x244   : > { %v2108_v48 = vpop.eup %2107 }
 0x245   : > { %v1514_v49 = vmul.f32 0.6931472, %v2108_v48 }
 0x247   : > { %1517 = vst [vmem:[%s341_s26] sm:$0xff] %v1514_v49 }
 0x248   : > { %v2110_v50 = vpop.eup %2109 }
 0x249   : > { %v1516_v34 = vmul.f32 0.6931472, %v2110_v50 }
 0x24b   : > { %1518 = vst [vmem:[%s341_s26 + $0x8] sm:$0xff] %v1516_v34 }
 0x24c PF: > { %s16_s17 = sadd.s32 1, %s2193_s17   ;;  %s2355_s15 = smov %s2189_s16 }
 0x24d   : > { %p13_p3 = scmp.ge.s32.totalorder %s16_s17, 4   ;;  %s2356_s16 = smov %s2358_s19 }
 0x24f   :  { %15 = sbr.rel (!%p13_p3) target bundleno = 3 (0x3), region = 80 }
 0x254   :  { %1549 = vsyncpa [#allocation3], 1 }
 0x255   :  { %1551 = vsyncpa [#allocation3 + $0x1], 1 }
 0x256   :  { %1552 = vsyncpa [#allocation5], 1 }

</bundles_post_ra>
